<compile_context>
chip_gen: v7x
topology: tpu7x:2x2x1
jax: 0.10.0
libtpu: 0.0.40
codegen_flags: <defaults>
</compile_context>

<pallas_src>
import jax
import jax.numpy as jnp
from jax.experimental import pallas as pl
from jax.experimental.pallas import tpu as pltpu


def _ce_kernel(logits_ref, labels_ref, loss_ref):
    # logits_ref: (T, C) native dtype in VMEM
    # labels_ref: (1, T) int32 in VMEM (lane-major)
    # loss_ref  : (1, T) f32 in VMEM (lane-major)
    logits = logits_ref[...]                                   # (T, C) native dtype
    t, c = logits.shape

    # Lane -> sublane relayout of the label row so it broadcasts per logit row.
    labels_col = jnp.transpose(labels_ref[...])                # (T, 1) int32

    # Target-logit gather at native width via lane-index compare (no dynamic
    # gather on TPU).  Out-of-range labels match nothing -> contribute 0.
    col = jax.lax.broadcasted_iota(jnp.int32, (t, c), 1)       # (T, C)
    target = jnp.sum(
        jnp.where(col == labels_col, logits, jnp.zeros((), logits.dtype)),
        axis=-1, keepdims=True).astype(jnp.float32)            # (T, 1) exact (single nonzero)

    # Numerically stable log-sum-exp in f32.
    logits_f32 = logits.astype(jnp.float32)
    m = jnp.max(logits_f32, axis=-1, keepdims=True)            # (T, 1)
    sum_exp = jnp.sum(jnp.exp(logits_f32 - m), axis=-1, keepdims=True)
    loss_col = m + jnp.log(sum_exp) - target                   # (T, 1)

    # PyTorch CrossEntropyLoss(reduction='none') emits 0 for ignore_index rows
    # (default -100); treat any out-of-range label the same way.
    valid = jnp.logical_and(labels_col >= 0, labels_col < c)
    loss_col = jnp.where(valid, loss_col, jnp.zeros((), jnp.float32))

    # Sublane -> lane relayout so the store is a lane-dense (1, T) row
    # (no masked narrow column stores).
    loss_ref[...] = jnp.transpose(loss_col).astype(loss_ref.dtype)


def _vmem_limit_bytes():
    """Generation-aware scoped-VMEM limit (explicit, not the scoped default)."""
    default_capacity = 64 * 1024 * 1024          # conservative: v7x per-TC VMEM
    try:
        capacity = int(pltpu.get_tpu_info().vmem_capacity_bytes)
    except Exception:
        capacity = default_capacity
    if capacity <= 0:
        capacity = default_capacity
    # Half of physical, capped at 48 MiB: 32 MiB on v7x (64 MiB phys), 48 MiB on
    # v5e/v6e (128 MiB phys).  Always at or above the per-chip scoped defaults.
    return min(capacity // 2, 48 * 1024 * 1024)


def _choose_tile_n(n, c, itemsize, vmem_limit_bytes):
    """Row tile sized by bytes against a generation-aware VMEM budget.

    Per-row accounting (worst case):
      * 2 * C * itemsize   double-buffered native logits block
      * 3 * C * 4          in-kernel f32 temporaries over the block
                           (upcast copy, exp argument/result, iota/select)
      * 6 * 512            per-row (T,1) temporaries if spilled with full
                           (8,128) vreg padding (labels/m/sum/target/loss/mask)
      * 128                lane-major labels + loss blocks, double-buffered
    """
    budget = (vmem_limit_bytes * 3) // 4          # leave 25% headroom
    per_row = 2 * c * itemsize + 3 * c * 4 + 6 * 512 + 128
    tile = budget // max(per_row, 1)
    if tile >= n:
        return n                                  # single full-extent block
    tile = max(128, (tile // 128) * 128)          # lane constraint of (1, tile) blocks
    return min(tile, n)


def _sanitize_tile_n(tile, n):
    if tile >= n:
        return n
    tile = max(128, (int(tile) // 128) * 128)
    return min(tile, n)


def classification_loss(pred_label, y_label, pred_mmap=None, y_mmap=None,
                        *, tile_n=None):
    """CrossEntropyLoss(reduction='none')(pred_label, y_label). mmap args unused."""
    n, c = pred_label.shape
    itemsize = jnp.dtype(pred_label.dtype).itemsize

    vmem_limit = _vmem_limit_bytes()
    if tile_n is None:
        tile_n = _choose_tile_n(n, c, itemsize, vmem_limit)
    else:
        tile_n = _sanitize_tile_n(tile_n, n)

    labels_row = y_label.astype(jnp.int32).reshape(1, n)       # lane-major labels

    cost = pl.CostEstimate(
        flops=7 * n * c,                        # max/sub/cmp/select/sum/add per elem
        transcendentals=n * c + n,              # exp per elem + log per row
        bytes_accessed=n * c * itemsize + 4 * n + 4 * n,
    )

    out = pl.pallas_call(
        _ce_kernel,
        out_shape=jax.ShapeDtypeStruct((1, n), jnp.float32),   # lane-major output
        grid=(pl.cdiv(n, tile_n),),
        in_specs=[
            pl.BlockSpec((tile_n, c), lambda i: (i, 0)),       # logits rows, full class axis
            pl.BlockSpec((1, tile_n), lambda i: (0, i)),       # labels (lane-major)
        ],
        out_specs=pl.BlockSpec((1, tile_n), lambda i: (0, i)), # loss (lane-major)
        compiler_params=pltpu.CompilerParams(
            dimension_semantics=("parallel",),                 # rows independent (v7x megacore)
            vmem_limit_bytes=vmem_limit,
        ),
        cost_estimate=cost,
    )(pred_label, labels_row)                   # native dtype in; f32 math in-kernel
    return out.reshape(n)


def _reference(pred_label, y_label):
    logits = pred_label.astype(jnp.float32)
    c = logits.shape[-1]
    lse = jax.nn.logsumexp(logits, axis=-1)
    idx = jnp.clip(y_label.astype(jnp.int32), 0, c - 1)
    tgt = jnp.take_along_axis(logits, idx[:, None], axis=-1)[:, 0]
    valid = (y_label >= 0) & (y_label < c)
    return jnp.where(valid, lse - tgt, 0.0)


if __name__ == "__main__":
    key = jax.random.PRNGKey(0)
    k1, k2, k3, k4, k5, k6 = jax.random.split(key, 6)

    # Small shapes consistent with the module: batch of 8 samples, 32 classes.
    N, C = 8, 32
    pred_label = jax.random.normal(k1, (N, C), dtype=jnp.float32)
    y_label = jax.random.randint(k2, (N,), 0, C, dtype=jnp.int32)
    # Exercise PyTorch's default ignore_index=-100 (loss must be 0 for that row).
    y_label = y_label.at[3].set(-100)
    # Unused auxiliary inputs (mirroring the PyTorch forward signature).
    pred_mmap = jax.random.normal(k3, (2, 1, 16, 16), dtype=jnp.float32)
    y_mmap = jax.random.normal(k4, (2, 1, 16, 16), dtype=jnp.float32)

    losses = jax.block_until_ready(
        classification_loss(pred_label, y_label, pred_mmap, y_mmap))
    ref = _reference(pred_label, y_label)
    assert losses.shape == (N,)
    assert jnp.allclose(losses, ref, atol=1e-5, rtol=1e-5)
    assert float(losses[3]) == 0.0

    # Second check: tiled / pipelined path (grid > 1, partial last block, bf16
    # logits streamed at native width, C not a multiple of 128 as a guard on
    # Mosaic's padded-lane masking in the reductions).
    N2, C2 = 272, 160
    pred2 = jax.random.normal(k5, (N2, C2), dtype=jnp.bfloat16)
    y2 = jax.random.randint(k6, (N2,), 0, C2, dtype=jnp.int32)
    losses2 = jax.block_until_ready(classification_loss(pred2, y2, tile_n=128))
    ref2 = _reference(pred2, y2)
    assert losses2.shape == (N2,)
    assert jnp.allclose(losses2, ref2, atol=2e-2, rtol=2e-2)  # bf16 input tolerance

    print("KERNEL_OK")
</pallas_src>

<mosaic_0001>
module attributes {stable_mosaic.version = 11 : i64} {
  func.func @_ce_kernel(%arg0: i32, %arg1: memref<8x32xf32, #tpu.memory_space<vmem>>, %arg2: memref<1x8xi32, #tpu.memory_space<vmem>>, %arg3: memref<1x8xf32, #tpu.memory_space<vmem>>) attributes {dimension_semantics = [#tpu.dimension_semantics<parallel>], iteration_bounds = array<i64: 1>, scalar_prefetch = 0 : i64, scratch_operands = 0 : i64, tpu.core_type = #tpu.core_type<tc>, window_params = [{transform_indices = @transform_0, window_bounds = array<i64: 8, 32>}, {transform_indices = @transform_1, window_bounds = array<i64: 1, 8>}, {transform_indices = @transform_2, window_bounds = array<i64: 1, 8>}]} {
    %c0 = arith.constant 0 : index
    %c0_0 = arith.constant 0 : index
    %0 = vector.load %arg1[%c0, %c0_0] : memref<8x32xf32, #tpu.memory_space<vmem>>, vector<8x32xf32>
    %c0_1 = arith.constant 0 : index
    %c0_2 = arith.constant 0 : index
    %1 = vector.load %arg2[%c0_1, %c0_2] : memref<1x8xi32, #tpu.memory_space<vmem>>, vector<1x8xi32>
    %2 = tpu.transpose %1, [1, 0] : vector<1x8xi32> -> vector<8x1xi32>
    %3 = tpu.iota {dimensions = array<i32: 1>} : vector<8x32xi32>
    %4 = vector.broadcast %2 : vector<8x1xi32> to vector<8x32xi32>
    %5 = arith.cmpi eq, %3, %4 : vector<8x32xi32>
    %cst = arith.constant 0.000000e+00 : f32
    %6 = vector.broadcast %cst : f32 to vector<8x32xf32>
    %7 = arith.select %5, %0, %6 : vector<8x32xi1>, vector<8x32xf32>
    %cst_3 = arith.constant dense<0.000000e+00> : vector<8xf32>
    %8 = vector.multi_reduction <add>, %7, %cst_3 [1] : vector<8x32xf32> to vector<8xf32>
    %9 = vector.shape_cast %8 : vector<8xf32> to vector<8x1xf32>
    %cst_4 = arith.constant dense<0xFF800000> : vector<8xf32>
    %10 = vector.multi_reduction <maximumf>, %0, %cst_4 [1] : vector<8x32xf32> to vector<8xf32>
    %11 = vector.shape_cast %10 : vector<8xf32> to vector<8x1xf32>
    %12 = vector.broadcast %11 : vector<8x1xf32> to vector<8x32xf32>
    %13 = arith.subf %0, %12 : vector<8x32xf32>
    %14 = math.exp %13 : vector<8x32xf32>
    %cst_5 = arith.constant dense<0.000000e+00> : vector<8xf32>
    %15 = vector.multi_reduction <add>, %14, %cst_5 [1] : vector<8x32xf32> to vector<8xf32>
    %16 = vector.shape_cast %15 : vector<8xf32> to vector<8x1xf32>
    %17 = math.log %16 : vector<8x1xf32>
    %18 = arith.addf %11, %17 : vector<8x1xf32>
    %19 = arith.subf %18, %9 : vector<8x1xf32>
    %c0_i32 = arith.constant 0 : i32
    %20 = vector.broadcast %c0_i32 : i32 to vector<8x1xi32>
    %21 = arith.cmpi sge, %2, %20 : vector<8x1xi32>
    %c32_i32 = arith.constant 32 : i32
    %22 = vector.broadcast %c32_i32 : i32 to vector<8x1xi32>
    %23 = arith.cmpi slt, %2, %22 : vector<8x1xi32>
    %24 = arith.andi %21, %23 : vector<8x1xi1>
    %cst_6 = arith.constant 0.000000e+00 : f32
    %25 = vector.broadcast %cst_6 : f32 to vector<8x1xf32>
    %26 = arith.select %24, %19, %25 : vector<8x1xi1>, vector<8x1xf32>
    %27 = tpu.transpose %26, [1, 0] : vector<8x1xf32> -> vector<1x8xf32>
    %c0_7 = arith.constant 0 : index
    %c0_8 = arith.constant 0 : index
    %28 = vector.load %arg3[%c0_7, %c0_8] : memref<1x8xf32, #tpu.memory_space<vmem>>, vector<1x8xf32>
    tpu.vector_store %arg3[%c0_7, %c0_8], %27 {strides = array<i32>} : memref<1x8xf32, #tpu.memory_space<vmem>>, vector<1x8xf32>,
    return
  }
  func.func @transform_0(%arg0: i32) -> (i32, i32) {
    %c0_i32 = arith.constant 0 : i32
    %c0_i32_0 = arith.constant 0 : i32
    return %arg0, %c0_i32 : i32, i32
  }
  func.func @transform_1(%arg0: i32) -> (i32, i32) {
    %c0_i32 = arith.constant 0 : i32
    %c0_i32_0 = arith.constant 0 : i32
    return %c0_i32, %arg0 : i32, i32
  }
  func.func @transform_2(%arg0: i32) -> (i32, i32) {
    %c0_i32 = arith.constant 0 : i32
    %c0_i32_0 = arith.constant 0 : i32
    return %c0_i32, %arg0 : i32, i32
  }
}

</mosaic_0001>

<bundles_post_ra>
// kernel: tpu_custom_call.1
= control target key start
LH: loop header
LB: loop body
LE: loop exit
PB: predicated region body
PF: predicated region fallthrough
CT: control target
= control target key end

     0   :  { %7 = vsyncpa [#allocation3], 0  ;;  %s241_s0 = inlined_call_operand.hbm [shape: f32[8,32], index: 0, kind: input, shape index: {}]   ;;  %s242_s1 = inlined_call_operand.vmem [shape: s32[1,8], index: 1, kind: input, shape index: {}]   ;;  %s243_s2 = inlined_call_operand.hbm [shape: f32[1,8], index: 2, kind: output, shape index: {}]  }
   0x1   :  { %8 = vsyncpa [#allocation4], 0  ;;  %s193_s9 = smov [#allocation2]   ;;  %s145_s13 = scalar_lea.hbm %s241_s0, 128 }
   0x2   :  { %s15_s10 = sshll.u32 %s193_s9, 4  ;;  %p146_p0 = scmp.ne.s32.totalorder %s241_s0, %s145_s13  ;;  %s16_s10 = int_to_ptr.vmem [resolvable:$true] %s15_s10 }
   0x3   :  { %p149_p1 = scmp.lt.u32.totalorder %s145_s13, %s241_s0 }
   0x5   :  { %p151_p2 = pnand %p149_p1, %p146_p0 }
   0x7   :  { %154 = shalt.err (!%p151_p2)
}
   0x8   :  { %s155_s18 = scalar_lea.vmem %s16_s10, 128  ;;  %p160_p4 = scmp.lt.s32.totalorder %s16_s10, %s16_s10 }
   0x9   :  { %p156_p3 = scmp.ne.s32.totalorder %s16_s10, %s155_s18  ;;  %p161_p5 = scmp.lt.s32.totalorder %s155_s18, %s155_s18 }
   0xb   :  { %p162_p6 = por %p161_p5, %p160_p4 }
   0xd   :  { %p163_p7 = pnand %p162_p6, %p156_p3 }
   0xf   :  { %166 = shalt.err (!%p163_p7)
}
  0x10   :  { %18 = dma.hbm_to_vmem [thread:$0]  %s241_s0, 128, %s16_s10, [#allocation3]  }
  0x11   :  { %189 = dma.done.wait [#allocation3], 128  }
  0x12   :  { %190 = vsyncadd [#allocation3], 4294967168  ;;  %v194_v0 = vmov 0   ;;  %v25_v1 = vld [vmem:[%s242_s1] sm:$0x1]  ;;  %vm65_vm0 = vcmask 261120   ;;  %v58_v10 = vlaneseq }
  0x13   :  { %139 = vset.pattern.permute.xlu1 %v194_v0  ;;  %26 = vxpose.xlu0.b32.start.end [1/1] (short) (narrow) %v25_v1, 8  ;;  %v24_v2 = vld [vmem:[#allocation2] sm:$0xff]  ;;  %s195_s0 = smov [#allocation5]   ;;  %vm118_vm5 = vcmask 57344  }
  0x14   :  { %v69_v3 = vsel %vm65_vm0, %v24_v2, -inf  ;;  %v59_v11 = vand.u32 127, %v58_v10  ;;  %s126_s1 = sshll.u32 %s195_s0, 4  ;;  %s127_s1 = int_to_ptr.vmem [resolvable:$true] %s126_s1 }
  0x15   :  { %s167_s23 = scalar_lea.vmem %s127_s1, 16  ;;  %s171_s24 = scalar_lea.vmem %s127_s1, 32 }
  0x16   :  { %p168_p8 = scmp.ne.s32.totalorder %s127_s1, %s167_s23  ;;  %p172_p9 = scmp.lt.s32.totalorder %s127_s1, %s127_s1 }
  0x17   :  { %p173_p10 = scmp.lt.s32.totalorder %s171_s24, %s167_s23 }
  0x19   :  { %p174_p11 = por %p173_p10, %p172_p9 }
  0x1b   :  { %p175_p12 = pnand %p174_p11, %p168_p8 }
  0x3c   :  { %140 = vset.pattern.permute.xlu0 %v194_v0 }
  0x40   :  { %70 = vmax.xlane.f32.xlu0 %v69_v3 }
  0x93   :  { %v42_v4 = vpop.trf.xlu0 }
  0x94   :  { %61 = vperm.xlu1 %139, %v42_v4   ;;  %vm82_vm2 = vcmp.ge.s32.totalorder %v42_v4, 0  ;;  %vm83_vm3 = vcmp.lt.s32.totalorder %v42_v4, 32 }
  0x95   :  { %vm84_vm4 = vmand %vm82_vm2, %vm83_vm3 }
  0xcd   :  { %v71_v5 = vpop.xlane.xlu0 %70 }
  0xce   :  { %v72_v6 = vsub.f32 %v24_v2, %v71_v5 }
  0xd0   :  { %v73_v7 = vmul.f32 1.442695, %v72_v6 }
  0xd2   :  { %141 = vpow2.f32 %v73_v7 }
  0xdc   :  { %v142_v8 = vpop.eup %141 }
  0xdd   :  { %v75_v9 = vsel %vm65_vm0, %v142_v8, 0.0 }
  0xde   :  { %76 = vadd.xlane.f32.xlu1 %v75_v9 }
 0x113   :  { %v62_v12 = vpop.permute.xlu1 %61 }
 0x114   :  { %vm63_vm1 = vcmp.eq.s32.totalorder %v59_v11, %v62_v12 }
 0x115   :  { %v64_v13 = vsel %vm63_vm1, %v24_v2, 0.0 }
 0x116   :  { %v66_v14 = vsel %vm65_vm0, %v64_v13, 0.0 }
 0x117   :  { %67 = vadd.xlane.f32.xlu1 %v66_v14 }
 0x16b   :  { %v77_v15 = vpop.xlane.xlu1 %76 }
 0x16c   :  { %143 = vlog2.f32 %v77_v15 }
 0x176   :  { %v144_v16 = vpop.eup %143 }
 0x177   :  { %v79_v17 = vmul.f32 0.6931472, %v144_v16 }
 0x179   :  { %v80_v18 = vadd.f32 %v79_v17, %v71_v5 }
 0x1a4   :  { %v68_v19 = vpop.xlane.xlu1 %67 }
 0x1a5   :  { %v81_v20 = vsub.f32 %v80_v18, %v68_v19 }
 0x1a7   :  { %v85_v21 = vsel %vm84_vm4, %v81_v20, 0.0 }
 0x1a8   :  { %86 = vxpose.xlu1.b32.start.end [1/1] (short) (narrow) %v85_v21, 8 }
 0x228   :  { %v102_v22 = vpop.trf.xlu1 }
 0x229   :  { %119 = vst.msk [vmem:[#allocation5] sm:$0x1] %vm118_vm5, %v102_v22 }
 0x22a   :  { %178 = shalt.err (!%p175_p12)
}
 0x22b   :  { %s179_s27 = scalar_lea.hbm %s243_s2, 16 }
 0x22c   :  { %p180_p13 = scmp.ne.s32.totalorder %s243_s2, %s179_s27  ;;  %p183_p0 = scmp.lt.u32.totalorder %s179_s27, %s243_s2 }
 0x22e   :  { %p185_p1 = pnand %p183_p0, %p180_p13 }
 0x230   :  { %188 = shalt.err (!%p185_p1)
}
 0x231   :  { %129 = dma.vmem_to_hbm [thread:$0]  %s127_s1, 16, %s243_s2, [#allocation4]  }
 0x232   :  { %191 = dma.done.wait [#allocation4], 16  }
 0x233   :  { %192 = vsyncadd [#allocation4], 4294967280 }
 0x234   :  { %133 = vsyncpa [#allocation3], 1 }
 0x235   :  { %134 = vsyncpa [#allocation4], 1 }

</bundles_post_ra>
